<compile_context>
chip_gen: v7x
topology: tpu7x:2x2x1
jax: 0.10.0
libtpu: 0.0.40
codegen_flags: <defaults>
</compile_context>

<pallas_src>
import functools
import math

import jax
import jax.numpy as jnp
from jax import lax
from jax.experimental import pallas as pl
from jax.experimental.pallas import tpu as pltpu

_LANES = 384  # 128 points * 3 interleaved coordinates per slab row


@functools.lru_cache(maxsize=None)
def _roll_shift_table(width: int):
    """Static shift amounts for pltpu.roll, probed once on the device.

    Returns (s_f1, s_f2, s_b1, s_b2) such that for a (rows, width) array v:
      roll(v, s_f1, axis=1)[:, l] == v[:, (l + 1) % width]
      roll(v, s_f2, axis=1)[:, l] == v[:, (l + 2) % width]
      roll(v, s_b1, axis=1)[:, l] == v[:, (l - 1) % width]
      roll(v, s_b2, axis=1)[:, l] == v[:, (l - 2) % width]
    The tiny probe makes the kernel independent of the rotate-direction
    convention of pltpu.roll (both conventions are pure rotations).
    """

    def probe(x_ref, o_ref):
        o_ref[...] = pltpu.roll(x_ref[...], 1, axis=1)

    x = jnp.tile(lax.iota(jnp.float32, width)[None, :], (8, 1))
    y = pl.pallas_call(
        probe, out_shape=jax.ShapeDtypeStruct((8, width), jnp.float32))(x)
    numpy_convention = bool(jax.device_get(y)[0, 0] == float(width - 1))
    if numpy_convention:  # roll(v, s)[l] == v[l - s]  (jnp.roll-like)
        return (width - 1, width - 2, 1, 2)
    return (1, 2, width - 1, width - 2)  # roll(v, s)[l] == v[l + s]


def _contract_kernel(x_ref, xmask_ref, o_ref, *, inv_scale, normalize,
                     use_inf_norm, s_f1, s_f2, s_b1, s_b2):
    # x_ref / o_ref: (tile_rows, 384) blocks; lanes hold x0 y0 z0 x1 y1 z1 ...
    # xmask_ref: (1, 384) with 1.0 on "x" lanes (lane % 3 == 0), else 0.0.
    x = x_ref[...].astype(jnp.float32) * inv_scale

    v = jnp.abs(x) if use_inf_norm else x * x

    # Per-point reduce, anchored at each point's x-lane:
    #   g[l] = v[l] (op) v[l+1] (op) v[l+2]   -- valid where lane % 3 == 0.
    f1 = pltpu.roll(v, s_f1, axis=1)          # v at lane l+1
    f2 = pltpu.roll(v, s_f2, axis=1)          # v at lane l+2
    if use_inf_norm:
        g = jnp.maximum(v, jnp.maximum(f1, f2))
    else:
        g = v + f1 + f2

    # Broadcast the anchored value back to all 3 lanes of the point.  Keeping
    # only the x-lane anchors (zeros elsewhere) makes the additive spread safe
    # against lane wrap-around / neighbouring points.
    gx = g * xmask_ref[...]
    mag = gx + pltpu.roll(gx, s_b1, axis=1) + pltpu.roll(gx, s_b2, axis=1)
    # mag = ||p||_inf (inf path) or ||p||_2^2 (L2 path), per lane.

    if use_inf_norm:
        inv = pl.reciprocal(mag)              # exact 1/||p||_inf
    else:
        inv = lax.rsqrt(mag)                  # EUP: 1/||p||_2 directly from sumsq
    factor = (2.0 - inv) * inv                # (2 - 1/mag) / mag
    # mag < 1  <=>  ||p|| < 1 for both paths (mag is the squared norm on L2).
    factor = jnp.where(mag < 1.0, 1.0, factor)

    if normalize:                             # (out + 2) / 4 folded in
        out = x * (factor * 0.25) + 0.5
    else:
        out = x * factor
    # Zero / garbage (padded) points hit the mag < 1 branch or are masked on
    # writeback of the ragged last block, so inf/NaN from 1/0 never escapes.

    o_ref[...] = out.astype(o_ref.dtype)


def scaled_scene_contraction(positions, *, order=None, scale=1.0,
                             normalize=True, tile_points=131072):
    """Pallas implementation of ScaledSceneContraction.forward (Tensor input).

    positions:   float array of shape (*bs, 3).
    order:       None (L2 / Frobenius) or float('inf').
    tile_points: points per grid step (rounded to 1024 = 8 rows of 128 points).
    """
    if order is None:
        use_inf_norm = False
    elif order == float("inf"):
        use_inf_norm = True
    else:
        raise NotImplementedError("Only order=None (L2) or float('inf').")

    assert positions.shape[-1] == 3, "last dim must be 3 (xyz)"
    batch_shape = positions.shape[:-1]
    n = math.prod(batch_shape)
    if n == 0:
        return positions

    flat = positions.reshape(n, 3)
    n_pad = ((n + 127) // 128) * 128
    if n_pad != n:
        # Only copies when N isn't a multiple of 128; otherwise zero extra HBM.
        flat = jnp.pad(flat, ((0, n_pad - n), (0, 0)))
    rows = n_pad // 128
    slab = flat.reshape(rows, _LANES)           # free row-major view, no copy

    # Rows per block: honor tile_points but never collapse the grid to one
    # step for mid/large inputs (keeps pipelining + v7x megacore sharding).
    req_rows = max(8, (int(tile_points) // 128 // 8) * 8)
    if rows <= 8:
        tile_r = rows                            # tiny input: one full-extent block
    else:
        target_steps = 8 if rows >= 64 else 2
        cap = max(8, ((rows // target_steps) // 8) * 8)
        tile_r = max(8, min(req_rows, cap))
    grid = (pl.cdiv(rows, tile_r),)

    # Lane mask marking each point's x-lane (lane % 3 == 0).
    xmask = (jnp.arange(_LANES) % 3 == 0).astype(jnp.float32).reshape(1, _LANES)

    s_f1, s_f2, s_b1, s_b2 = _roll_shift_table(_LANES)
    kernel = functools.partial(
        _contract_kernel, inv_scale=float(1.0 / scale),
        normalize=bool(normalize), use_inf_norm=use_inf_norm,
        s_f1=s_f1, s_f2=s_f2, s_b1=s_b1, s_b2=s_b2)

    itemsize = jnp.dtype(positions.dtype).itemsize
    block_bytes = tile_r * _LANES * max(itemsize, 4)
    cp_kwargs = dict(dimension_semantics=("parallel",))
    need = 4 * block_bytes + (1 << 20)           # double-buffered in + out
    if need > 12 * 1024 * 1024:                  # only raise the limit if required
        cp_kwargs["vmem_limit_bytes"] = int(min(need, 32 * 1024 * 1024))

    cost = pl.CostEstimate(
        flops=36 * n_pad,                        # ~12 VPU ops per lane element
        transcendentals=3 * n_pad,               # one rsqrt / reciprocal per lane
        bytes_accessed=2 * 3 * n_pad * itemsize)

    out_slab = pl.pallas_call(
        kernel,
        out_shape=jax.ShapeDtypeStruct((rows, _LANES), positions.dtype),
        grid=grid,
        in_specs=[pl.BlockSpec((tile_r, _LANES), lambda i: (i, 0)),
                  pl.BlockSpec((1, _LANES), lambda i: (0, 0))],
        out_specs=pl.BlockSpec((tile_r, _LANES), lambda i: (i, 0)),
        compiler_params=pltpu.CompilerParams(**cp_kwargs),
        cost_estimate=cost,
    )(slab, xmask)

    out = out_slab.reshape(n_pad, 3)
    if n_pad != n:
        out = out[:n]
    return out.reshape(*batch_shape, 3)


def _reference(positions, *, order=None, scale=1.0, normalize=True):
    x = positions.astype(jnp.float32) / scale
    if order is None:
        mag = jnp.linalg.norm(x, axis=-1, keepdims=True)
    else:
        mag = jnp.max(jnp.abs(x), axis=-1, keepdims=True)
    out = jnp.where(mag < 1.0, x, (2.0 - 1.0 / mag) * (x / mag))
    if normalize:
        out = (out + 2.0) / 4.0
    return out.astype(positions.dtype)


if __name__ == "__main__":
    key = jax.random.PRNGKey(0)
    k1, k2, k3, k4 = jax.random.split(key, 4)

    # (*bs, 3): batch=2, rays=4, samples=16 -> 128 points (one slab row).
    pos = 4.0 * jax.random.normal(k1, (2, 4, 16, 3), dtype=jnp.float32)
    scale = 2.0
    out = jax.block_until_ready(
        scaled_scene_contraction(pos, order=None, scale=scale, normalize=True))
    ref = _reference(pos, order=None, scale=scale, normalize=True)
    assert out.shape == pos.shape
    assert float(jnp.max(jnp.abs(out - ref))) < 1e-4

    # L-inf norm variant.
    out_inf = jax.block_until_ready(
        scaled_scene_contraction(pos, order=float("inf"), scale=scale,
                                 normalize=True))
    ref_inf = _reference(pos, order=float("inf"), scale=scale, normalize=True)
    assert float(jnp.max(jnp.abs(out_inf - ref_inf))) < 1e-4

    # Ragged point count (3*7*9 = 189 points -> host-padded to 256), no normalize.
    pos2 = 3.0 * jax.random.normal(k2, (3, 7, 9, 3), dtype=jnp.float32)
    out2 = jax.block_until_ready(
        scaled_scene_contraction(pos2, order=None, scale=1.0, normalize=False))
    ref2 = _reference(pos2, order=None, scale=1.0, normalize=False)
    assert out2.shape == pos2.shape
    assert float(jnp.max(jnp.abs(out2 - ref2))) < 1e-4

    # Multi-step grid with a ragged last block (1152 points -> 9 rows, tile 8).
    pos3 = 5.0 * jax.random.normal(k3, (4, 288, 3), dtype=jnp.float32)
    out3 = jax.block_until_ready(
        scaled_scene_contraction(pos3, order=None, scale=1.5, normalize=True))
    ref3 = _reference(pos3, order=None, scale=1.5, normalize=True)
    assert float(jnp.max(jnp.abs(out3 - ref3))) < 1e-4

    # Larger multi-block run (8192 points -> 64 rows, 8 grid steps), inf norm.
    pos4 = 4.0 * jax.random.normal(k4, (2, 4096, 3), dtype=jnp.float32)
    out4 = jax.block_until_ready(
        scaled_scene_contraction(pos4, order=float("inf"), scale=2.0,
                                 normalize=True))
    ref4 = _reference(pos4, order=float("inf"), scale=2.0, normalize=True)
    assert float(jnp.max(jnp.abs(out4 - ref4))) < 1e-4

    print("KERNEL_OK")
</pallas_src>

<mosaic_0001>
module attributes {stable_mosaic.version = 11 : i64} {
  func.func @probe(%arg0: memref<8x384xf32, #tpu.memory_space<vmem>>, %arg1: memref<8x384xf32, #tpu.memory_space<vmem>>) attributes {dimension_semantics = [], scalar_prefetch = 0 : i64, scratch_operands = 0 : i64, tpu.core_type = #tpu.core_type<tc>} {
    %c0 = arith.constant 0 : index
    %c0_0 = arith.constant 0 : index
    %0 = vector.load %arg0[%c0, %c0_0] : memref<8x384xf32, #tpu.memory_space<vmem>>, vector<8x384xf32>
    %c1_i32 = arith.constant 1 : i32
    %1 = tpu.dynamic_rotate %0 by %c1_i32 dim 1 : vector<8x384xf32>, i32 -> vector<8x384xf32>
    %c0_1 = arith.constant 0 : index
    %c0_2 = arith.constant 0 : index
    %2 = vector.load %arg1[%c0_1, %c0_2] : memref<8x384xf32, #tpu.memory_space<vmem>>, vector<8x384xf32>
    tpu.vector_store %arg1[%c0_1, %c0_2], %1 {strides = array<i32>} : memref<8x384xf32, #tpu.memory_space<vmem>>, vector<8x384xf32>,
    return
  }
}

</mosaic_0001>

<bundles_post_ra>
// kernel: tpu_custom_call.1
= control target key start
LH: loop header
LB: loop body
LE: loop exit
PB: predicated region body
PF: predicated region fallthrough
CT: control target
= control target key end

     0   :  { %6 = vsyncpa [#allocation3], 0  ;;  %s142_s0 = inlined_call_operand.hbm [shape: f32[8,384], index: 0, kind: input, shape index: {}]   ;;  %s143_s1 = inlined_call_operand.hbm [shape: f32[8,384], index: 1, kind: output, shape index: {}]  }
   0x1   :  { %7 = vsyncpa [#allocation4], 0  ;;  %s105_s6 = smov [#allocation2]   ;;  %s57_s10 = scalar_lea.hbm %s142_s0, 384 }
   0x2   :  { %s14_s7 = sshll.u32 %s105_s6, 4  ;;  %p58_p0 = scmp.ne.s32.totalorder %s142_s0, %s57_s10  ;;  %s15_s7 = int_to_ptr.vmem [resolvable:$true] %s14_s7 }
   0x3   :  { %p61_p1 = scmp.lt.u32.totalorder %s57_s10, %s142_s0 }
   0x5   :  { %p63_p2 = pnand %p61_p1, %p58_p0 }
   0x7   :  { %66 = shalt.err (!%p63_p2)
}
   0x8   :  { %s67_s15 = scalar_lea.vmem %s15_s7, 384  ;;  %p72_p4 = scmp.lt.s32.totalorder %s15_s7, %s15_s7 }
   0x9   :  { %p68_p3 = scmp.ne.s32.totalorder %s15_s7, %s67_s15  ;;  %p73_p5 = scmp.lt.s32.totalorder %s67_s15, %s67_s15 }
   0xb   :  { %p74_p6 = por %p73_p5, %p72_p4 }
   0xd   :  { %p75_p7 = pnand %p74_p6, %p68_p3 }
   0xf   :  { %78 = shalt.err (!%p75_p7)
}
  0x10   :  { %17 = dma.hbm_to_vmem [thread:$0]  %s142_s0, 384, %s15_s7, [#allocation3]  }
  0x11   :  { %101 = dma.done.wait [#allocation3], 384  }
  0x12   :  { %102 = vsyncadd [#allocation3], 4294966912  ;;  %v23_v0 = vld [vmem:[#allocation2 + $0x10] sm:$0xff]  ;;  %v21_v1 = vld [vmem:[#allocation2] sm:$0xff]  ;;  %s106_s18 = smov 1   ;;  %v30_v3 = vlaneseq  ;;  %s107_s19 = smov [#allocation5]  }
  0x13   :  { %28 = vrot.lane.b32.xlu1 %v23_v0, %s106_s18  ;;  %24 = vrot.lane.b32.xlu0 %v21_v1, %s106_s18  ;;  %v22_v2 = vld [vmem:[#allocation2 + $0x8] sm:$0xff]  ;;  %s45_s20 = sshll.u32 %s107_s19, 4  ;;  %s46_s20 = int_to_ptr.vmem [resolvable:$true] %s45_s20 }
  0x14   :  { %v31_v4 = vand.u32 127, %v30_v3  ;;  %s79_s0 = scalar_lea.vmem %s46_s20, 384  ;;  %p84_p9 = scmp.lt.s32.totalorder %s46_s20, %s46_s20 }
  0x15   :  { %p80_p8 = scmp.ne.s32.totalorder %s46_s20, %s79_s0  ;;  %p85_p10 = scmp.lt.s32.totalorder %s79_s0, %s79_s0 }
  0x16   :  { %vm32_vm0 = vcmp.lt.s32.totalorder %v31_v4, 1 }
  0x17   :  { %26 = vrot.lane.b32.xlu0 %v22_v2, %s106_s18  ;;  %p86_p11 = por %p85_p10, %p84_p9 }
  0x19   :  { %p87_p12 = pnand %p86_p11, %p80_p8 }
  0x85   :  { %v29_v5 = vpop.permute.xlu1 %28  ;;  %v25_v6 = vpop.permute.xlu0 %24 }
  0x86   :  { %v35_v7 = vsel %vm32_vm0, %v29_v5, %v25_v6 }
  0x87   :  { %36 = vst [vmem:[#allocation5] sm:$0xff] %v35_v7 }
  0x89   :  { %v27_v8 = vpop.permute.xlu0 %26 }
  0x8a   :  { %v33_v9 = vsel %vm32_vm0, %v27_v8, %v29_v5  ;;  %v34_v10 = vsel %vm32_vm0, %v25_v6, %v27_v8 }
  0x8b   :  { %37 = vst [vmem:[#allocation5 + $0x8] sm:$0xff] %v34_v10  ;;  %38 = vst [vmem:[#allocation5 + $0x10] sm:$0xff] %v33_v9 }
  0x8c   :  { %90 = shalt.err (!%p87_p12)
}
  0x8d   :  { %s91_s23 = scalar_lea.hbm %s143_s1, 384 }
  0x8e   :  { %p92_p13 = scmp.ne.s32.totalorder %s143_s1, %s91_s23  ;;  %p95_p0 = scmp.lt.u32.totalorder %s91_s23, %s143_s1 }
  0x90   :  { %p97_p1 = pnand %p95_p0, %p92_p13 }
  0x92   :  { %100 = shalt.err (!%p97_p1)
}
  0x93   :  { %48 = dma.vmem_to_hbm [thread:$0]  %s46_s20, 384, %s143_s1, [#allocation4]  }
  0x94   :  { %103 = dma.done.wait [#allocation4], 384  }
  0x95   :  { %104 = vsyncadd [#allocation4], 4294966912 }
  0x96   :  { %52 = vsyncpa [#allocation3], 1 }
  0x97   :  { %53 = vsyncpa [#allocation4], 1 }

</bundles_post_ra>
